<compile_context>
chip_gen: v5e
topology: v5e:2x2
jax: 0.10.0
libtpu: 0.0.40
codegen_flags: <defaults>
</compile_context>

<pallas_src>
import functools

import jax
import jax.numpy as jnp
from jax.experimental import pallas as pl
from jax.experimental.pallas import tpu as pltpu


_NEG_LARGE = -1e30  # effectively -inf for masked/initial running max (finite => no NaNs)


def _ce_ls_kernel(tgt_ref, x_ref, loss_ref,
                  m_acc, s_acc, sum_acc, t_acc,
                  *, epsilon, num_classes, tile_cols, padded_cols):
    """One (TB, TC) logits chunk of per-sample smoothed cross entropy.

    tgt_ref:  (TB, 1) int32 ground-truth class ids
    x_ref:    (TB, TC) logits chunk (any float dtype, promoted to f32)
    loss_ref: (TB, 1) f32 per-sample loss, written on the last class chunk
    Accumulators (carried across class chunks, all (TB, 1) f32):
      m_acc   running max of logits            (online logsumexp)
      s_acc   running sum of exp(x - m_acc)    (online logsumexp)
      sum_acc running sum of logits            (uniform smoothing term)
      t_acc   logit at the target class
    """
    j = pl.program_id(1)

    @pl.when(j == 0)
    def _init():
        m_acc[...] = jnp.full_like(m_acc, _NEG_LARGE)
        s_acc[...] = jnp.zeros_like(s_acc)
        sum_acc[...] = jnp.zeros_like(sum_acc)
        t_acc[...] = jnp.zeros_like(t_acc)

    x = x_ref[...].astype(jnp.float32)                        # (TB, TC)
    tb, tc = x.shape
    # Global class ids for this chunk (classes live on lanes).
    col = jax.lax.broadcasted_iota(jnp.int32, (tb, tc), 1) + j * tile_cols

    if padded_cols:  # static flag: only when C was padded up to a tile multiple
        valid = col < num_classes
        x_for_max = jnp.where(valid, x, _NEG_LARGE)           # exp() underflows to 0
        x_for_sum = jnp.where(valid, x, 0.0)
    else:
        x_for_max = x
        x_for_sum = x

    # Online logsumexp update.
    m_old = m_acc[...]
    m_new = jnp.maximum(m_old, jnp.max(x_for_max, axis=1, keepdims=True))
    s_acc[...] = (s_acc[...] * jnp.exp(m_old - m_new)
                  + jnp.sum(jnp.exp(x_for_max - m_new), axis=1, keepdims=True))
    m_acc[...] = m_new

    # Running sum of logits + target logit extraction (iota-compare + masked sum).
    sum_acc[...] += jnp.sum(x_for_sum, axis=1, keepdims=True)
    t_acc[...] += jnp.sum(jnp.where(col == tgt_ref[...], x, 0.0),
                          axis=1, keepdims=True)

    @pl.when(j == pl.num_programs(1) - 1)
    def _finalize():
        lse = m_acc[...] + jnp.log(s_acc[...])
        # loss_i = -(1-eps)*(x_t - lse) - (eps/C)*(sum_x - C*lse)
        #        = lse - (1-eps)*x_t - (eps/C)*sum_x
        loss_ref[...] = (lse
                         - (1.0 - epsilon) * t_acc[...]
                         - (epsilon / num_classes) * sum_acc[...])


def _choose_tiles(batch, num_classes, itemsize,
                  vmem_budget_bytes=24 * 1024 * 1024):
    """Pick (tile_rows, tile_cols) from a conservative VMEM budget.

    The double-buffered logits tile (2 * TB * TC * itemsize) is kept around
    ~24 MiB so it fits v7x's 64 MiB physical VMEM as well as v5e/v6e, while
    staying large enough to amortize the ~0.35 us per-grid-step overhead.
    The class tile is kept at full width (single chunk, no masking) whenever
    it fits; otherwise the largest 128-lane multiple.
    """
    if batch <= 16:
        tb = batch
    else:
        tb = min(512, batch)
        tb = max(16, (tb // 16) * 16)          # sublane multiple (covers bf16 packing)
    if 2 * tb * num_classes * itemsize <= vmem_budget_bytes:
        tc = num_classes                       # whole class dim in one chunk
    else:
        tc = vmem_budget_bytes // (2 * tb * itemsize)
        tc = max(128, (tc // 128) * 128)       # lane multiple
        tc = min(tc, num_classes)
    return tb, tc


def cross_entropy_label_smooth(inputs, targets, *, num_classes, epsilon=0.1,
                               reduction=True, tile_rows=None, tile_cols=None):
    """JAX/Pallas equivalent of CrossEntropyLabelSmooth.forward.

    inputs:  (B, num_classes) logits (pre-softmax), f32 or bf16
    targets: (B,) integer class labels
    """
    B, C = inputs.shape
    assert C == num_classes

    itemsize = jnp.dtype(inputs.dtype).itemsize
    tb_auto, tc_auto = _choose_tiles(B, C, itemsize)
    tb = min(tile_rows if tile_rows is not None else tb_auto, B)
    tc = min(tile_cols if tile_cols is not None else tc_auto, C)

    n_bt = pl.cdiv(B, tb)
    n_ct = pl.cdiv(C, tc)
    b_pad = n_bt * tb
    c_pad = n_ct * tc

    tgt2d = targets.astype(jnp.int32).reshape(B, 1)
    if b_pad != B:
        # Zero-pad rows to a whole number of tiles; padded rows produce finite
        # garbage losses that are sliced off before the reduction.
        inputs = jnp.pad(inputs, ((0, b_pad - B), (0, 0)))
        tgt2d = jnp.pad(tgt2d, ((0, b_pad - B), (0, 0)))
    if c_pad != C:
        # Padded columns are masked out inside the kernel (static flag).
        # TODO(synk): for very large vocabularies keep C a multiple of the
        # class tile so this one-off pad copy is never materialized.
        inputs = jnp.pad(inputs, ((0, 0), (0, c_pad - C)))

    kernel = functools.partial(
        _ce_ls_kernel,
        epsilon=float(epsilon), num_classes=int(num_classes),
        tile_cols=int(tc), padded_cols=(c_pad != C))

    per_sample = pl.pallas_call(
        kernel,
        out_shape=jax.ShapeDtypeStruct((b_pad, 1), jnp.float32),
        grid=(n_bt, n_ct),
        in_specs=[
            pl.BlockSpec((tb, 1), lambda i, j: (i, 0)),    # target ids (resident per row tile)
            pl.BlockSpec((tb, tc), lambda i, j: (i, j)),   # logits chunk
        ],
        out_specs=pl.BlockSpec((tb, 1), lambda i, j: (i, 0)),   # accumulator-style output
        scratch_shapes=[pltpu.VMEM((tb, 1), jnp.float32)] * 4,  # m, s, sum_x, x_target
        compiler_params=pltpu.CompilerParams(
            dimension_semantics=("parallel", "arbitrary"),      # megacore on batch tiles
            vmem_limit_bytes=48 * 1024 * 1024,
        ),
    )(tgt2d, inputs)

    loss = per_sample[:B, 0]                                    # drop padded rows
    return jnp.mean(loss) if reduction else loss


def _reference(inputs, targets, num_classes, epsilon=0.1, reduction=True):
    """Pure-JAX reference mirroring the PyTorch module."""
    log_probs = jax.nn.log_softmax(inputs.astype(jnp.float32), axis=1)
    one_hot = jax.nn.one_hot(targets, num_classes, dtype=jnp.float32)
    smoothed = (1.0 - epsilon) * one_hot + epsilon / num_classes
    loss = jnp.sum(-smoothed * log_probs, axis=1)
    return jnp.mean(loss) if reduction else loss


if __name__ == "__main__":
    EPSILON = 0.1
    key = jax.random.PRNGKey(0)
    k1, k2, k3, k4, k5, k6 = jax.random.split(key, 6)

    # 1) Small shapes consistent with the module's forward (single tile / chunk).
    NUM_CLASSES, BATCH = 16, 8
    inputs = jax.random.normal(k1, (BATCH, NUM_CLASSES), dtype=jnp.float32)
    targets = jax.random.randint(k2, (BATCH,), 0, NUM_CLASSES, dtype=jnp.int32)
    loss = cross_entropy_label_smooth(inputs, targets, num_classes=NUM_CLASSES,
                                      epsilon=EPSILON, reduction=True)
    loss = jax.block_until_ready(loss)
    ref = _reference(inputs, targets, NUM_CLASSES, EPSILON, reduction=True)
    assert jnp.allclose(loss, ref, atol=1e-5, rtol=1e-5), (loss, ref)

    # 2) Multi batch-tile (with row padding) + multi class-chunk streaming path.
    B2, C2 = 40, 384
    inputs2 = jax.random.normal(k3, (B2, C2), dtype=jnp.float32)
    targets2 = jax.random.randint(k4, (B2,), 0, C2, dtype=jnp.int32)
    loss2 = cross_entropy_label_smooth(inputs2, targets2, num_classes=C2,
                                       epsilon=EPSILON, reduction=True,
                                       tile_rows=16, tile_cols=128)
    loss2 = jax.block_until_ready(loss2)
    ref2 = _reference(inputs2, targets2, C2, EPSILON, reduction=True)
    assert jnp.allclose(loss2, ref2, atol=1e-5, rtol=1e-5), (loss2, ref2)

    # 3) Per-sample (reduction=False) path on the chunked config.
    loss3 = cross_entropy_label_smooth(inputs2, targets2, num_classes=C2,
                                       epsilon=EPSILON, reduction=False,
                                       tile_rows=16, tile_cols=128)
    loss3 = jax.block_until_ready(loss3)
    ref3 = _reference(inputs2, targets2, C2, EPSILON, reduction=False)
    assert jnp.allclose(loss3, ref3, atol=1e-5, rtol=1e-5)

    # 4) Class dim not a multiple of the class tile (column padding + mask).
    B4, C4 = 24, 200
    inputs4 = jax.random.normal(k5, (B4, C4), dtype=jnp.float32)
    targets4 = jax.random.randint(k6, (B4,), 0, C4, dtype=jnp.int32)
    loss4 = cross_entropy_label_smooth(inputs4, targets4, num_classes=C4,
                                       epsilon=EPSILON, reduction=True,
                                       tile_rows=8, tile_cols=128)
    loss4 = jax.block_until_ready(loss4)
    ref4 = _reference(inputs4, targets4, C4, EPSILON, reduction=True)
    assert jnp.allclose(loss4, ref4, atol=1e-5, rtol=1e-5), (loss4, ref4)

    print("KERNEL_OK")
</pallas_src>

<mosaic_0001>
module attributes {stable_mosaic.version = 11 : i64} {
  func.func @_ce_ls_kernel(%arg0: i32, %arg1: i32, %arg2: memref<8x1xi32, #tpu.memory_space<vmem>>, %arg3: memref<8x16xf32, #tpu.memory_space<vmem>>, %arg4: memref<8x1xf32, #tpu.memory_space<vmem>>, %arg5: memref<8x1xf32, #tpu.memory_space<vmem>>, %arg6: memref<8x1xf32, #tpu.memory_space<vmem>>, %arg7: memref<8x1xf32, #tpu.memory_space<vmem>>, %arg8: memref<8x1xf32, #tpu.memory_space<vmem>>) attributes {dimension_semantics = [#tpu.dimension_semantics<parallel>, #tpu.dimension_semantics<arbitrary>], iteration_bounds = array<i64: 1, 1>, scalar_prefetch = 0 : i64, scratch_operands = 4 : i64, tpu.core_type = #tpu.core_type<tc>, window_params = [{transform_indices = @transform_0, window_bounds = array<i64: 8, 1>}, {transform_indices = @transform_1, window_bounds = array<i64: 8, 16>}, {transform_indices = @transform_2, window_bounds = array<i64: 8, 1>}]} {
    %c0_i32 = arith.constant 0 : i32
    %0 = arith.cmpi eq, %arg1, %c0_i32 : i32
    %1 = arith.extui %0 : i1 to i32
    %c0_i32_0 = arith.constant 0 : i32
    %2 = arith.cmpi ne, %1, %c0_i32_0 : i32
    scf.if %2 {
      %cst_26 = arith.constant -1.000000e+30 : f32
      %42 = vector.broadcast %cst_26 : f32 to vector<8x1xf32>
      %c0_27 = arith.constant 0 : index
      %c0_28 = arith.constant 0 : index
      %43 = vector.load %arg5[%c0_27, %c0_28] : memref<8x1xf32, #tpu.memory_space<vmem>>, vector<8x1xf32>
      tpu.vector_store %arg5[%c0_27, %c0_28], %42 {strides = array<i32>} : memref<8x1xf32, #tpu.memory_space<vmem>>, vector<8x1xf32>,
      %cst_29 = arith.constant 0.000000e+00 : f32
      %44 = vector.broadcast %cst_29 : f32 to vector<8x1xf32>
      %c0_30 = arith.constant 0 : index
      %c0_31 = arith.constant 0 : index
      %45 = vector.load %arg6[%c0_30, %c0_31] : memref<8x1xf32, #tpu.memory_space<vmem>>, vector<8x1xf32>
      tpu.vector_store %arg6[%c0_30, %c0_31], %44 {strides = array<i32>} : memref<8x1xf32, #tpu.memory_space<vmem>>, vector<8x1xf32>,
      %cst_32 = arith.constant 0.000000e+00 : f32
      %46 = vector.broadcast %cst_32 : f32 to vector<8x1xf32>
      %c0_33 = arith.constant 0 : index
      %c0_34 = arith.constant 0 : index
      %47 = vector.load %arg7[%c0_33, %c0_34] : memref<8x1xf32, #tpu.memory_space<vmem>>, vector<8x1xf32>
      tpu.vector_store %arg7[%c0_33, %c0_34], %46 {strides = array<i32>} : memref<8x1xf32, #tpu.memory_space<vmem>>, vector<8x1xf32>,
      %cst_35 = arith.constant 0.000000e+00 : f32
      %48 = vector.broadcast %cst_35 : f32 to vector<8x1xf32>
      %c0_36 = arith.constant 0 : index
      %c0_37 = arith.constant 0 : index
      %49 = vector.load %arg8[%c0_36, %c0_37] : memref<8x1xf32, #tpu.memory_space<vmem>>, vector<8x1xf32>
      tpu.vector_store %arg8[%c0_36, %c0_37], %48 {strides = array<i32>} : memref<8x1xf32, #tpu.memory_space<vmem>>, vector<8x1xf32>,
    } else {
    }
    %c0 = arith.constant 0 : index
    %c0_1 = arith.constant 0 : index
    %3 = vector.load %arg3[%c0, %c0_1] : memref<8x16xf32, #tpu.memory_space<vmem>>, vector<8x16xf32>
    %4 = tpu.iota {dimensions = array<i32: 1>} : vector<8x16xi32>
    %c16_i32 = arith.constant 16 : i32
    %5 = arith.muli %arg1, %c16_i32 : i32
    %6 = vector.broadcast %5 : i32 to vector<8x16xi32>
    %7 = arith.addi %4, %6 : vector<8x16xi32>
    %c0_2 = arith.constant 0 : index
    %c0_3 = arith.constant 0 : index
    %8 = vector.load %arg5[%c0_2, %c0_3] : memref<8x1xf32, #tpu.memory_space<vmem>>, vector<8x1xf32>
    %cst = arith.constant dense<0xFF800000> : vector<8xf32>
    %9 = vector.multi_reduction <maximumf>, %3, %cst [1] : vector<8x16xf32> to vector<8xf32>
    %10 = vector.shape_cast %9 : vector<8xf32> to vector<8x1xf32>
    %11 = arith.maximumf %8, %10 : vector<8x1xf32>
    %c0_4 = arith.constant 0 : index
    %c0_5 = arith.constant 0 : index
    %12 = vector.load %arg6[%c0_4, %c0_5] : memref<8x1xf32, #tpu.memory_space<vmem>>, vector<8x1xf32>
    %13 = arith.subf %8, %11 : vector<8x1xf32>
    %14 = math.exp %13 : vector<8x1xf32>
    %15 = arith.mulf %12, %14 : vector<8x1xf32>
    %16 = vector.broadcast %11 : vector<8x1xf32> to vector<8x16xf32>
    %17 = arith.subf %3, %16 : vector<8x16xf32>
    %18 = math.exp %17 : vector<8x16xf32>
    %cst_6 = arith.constant dense<0.000000e+00> : vector<8xf32>
    %19 = vector.multi_reduction <add>, %18, %cst_6 [1] : vector<8x16xf32> to vector<8xf32>
    %20 = vector.shape_cast %19 : vector<8xf32> to vector<8x1xf32>
    %21 = arith.addf %15, %20 : vector<8x1xf32>
    %c0_7 = arith.constant 0 : index
    %c0_8 = arith.constant 0 : index
    %22 = vector.load %arg6[%c0_7, %c0_8] : memref<8x1xf32, #tpu.memory_space<vmem>>, vector<8x1xf32>
    tpu.vector_store %arg6[%c0_7, %c0_8], %21 {strides = array<i32>} : memref<8x1xf32, #tpu.memory_space<vmem>>, vector<8x1xf32>,
    %c0_9 = arith.constant 0 : index
    %c0_10 = arith.constant 0 : index
    %23 = vector.load %arg5[%c0_9, %c0_10] : memref<8x1xf32, #tpu.memory_space<vmem>>, vector<8x1xf32>
    tpu.vector_store %arg5[%c0_9, %c0_10], %11 {strides = array<i32>} : memref<8x1xf32, #tpu.memory_space<vmem>>, vector<8x1xf32>,
    %c0_11 = arith.constant 0 : index
    %c0_12 = arith.constant 0 : index
    %24 = vector.load %arg7[%c0_11, %c0_12] : memref<8x1xf32, #tpu.memory_space<vmem>>, vector<8x1xf32>
    %cst_13 = arith.constant dense<0.000000e+00> : vector<8xf32>
    %25 = vector.multi_reduction <add>, %3, %cst_13 [1] : vector<8x16xf32> to vector<8xf32>
    %26 = vector.shape_cast %25 : vector<8xf32> to vector<8x1xf32>
    %27 = arith.addf %24, %26 : vector<8x1xf32>
    %c0_14 = arith.constant 0 : index
    %c0_15 = arith.constant 0 : index
    %28 = vector.load %arg7[%c0_14, %c0_15] : memref<8x1xf32, #tpu.memory_space<vmem>>, vector<8x1xf32>
    tpu.vector_store %arg7[%c0_14, %c0_15], %27 {strides = array<i32>} : memref<8x1xf32, #tpu.memory_space<vmem>>, vector<8x1xf32>,
    %c0_16 = arith.constant 0 : index
    %c0_17 = arith.constant 0 : index
    %29 = vector.load %arg8[%c0_16, %c0_17] : memref<8x1xf32, #tpu.memory_space<vmem>>, vector<8x1xf32>
    %c0_18 = arith.constant 0 : index
    %c0_19 = arith.constant 0 : index
    %30 = vector.load %arg2[%c0_18, %c0_19] : memref<8x1xi32, #tpu.memory_space<vmem>>, vector<8x1xi32>
    %31 = vector.broadcast %30 : vector<8x1xi32> to vector<8x16xi32>
    %32 = arith.cmpi eq, %7, %31 : vector<8x16xi32>
    %cst_20 = arith.constant 0.000000e+00 : f32
    %33 = vector.broadcast %cst_20 : f32 to vector<8x16xf32>
    %34 = arith.select %32, %3, %33 : vector<8x16xi1>, vector<8x16xf32>
    %cst_21 = arith.constant dense<0.000000e+00> : vector<8xf32>
    %35 = vector.multi_reduction <add>, %34, %cst_21 [1] : vector<8x16xf32> to vector<8xf32>
    %36 = vector.shape_cast %35 : vector<8xf32> to vector<8x1xf32>
    %37 = arith.addf %29, %36 : vector<8x1xf32>
    %c0_22 = arith.constant 0 : index
    %c0_23 = arith.constant 0 : index
    %38 = vector.load %arg8[%c0_22, %c0_23] : memref<8x1xf32, #tpu.memory_space<vmem>>, vector<8x1xf32>
    tpu.vector_store %arg8[%c0_22, %c0_23], %37 {strides = array<i32>} : memref<8x1xf32, #tpu.memory_space<vmem>>, vector<8x1xf32>,
    %c0_i32_24 = arith.constant 0 : i32
    %39 = arith.cmpi eq, %arg1, %c0_i32_24 : i32
    %40 = arith.extui %39 : i1 to i32
    %c0_i32_25 = arith.constant 0 : i32
    %41 = arith.cmpi ne, %40, %c0_i32_25 : i32
    scf.if %41 {
      %c0_26 = arith.constant 0 : index
      %c0_27 = arith.constant 0 : index
      %42 = vector.load %arg5[%c0_26, %c0_27] : memref<8x1xf32, #tpu.memory_space<vmem>>, vector<8x1xf32>
      %c0_28 = arith.constant 0 : index
      %c0_29 = arith.constant 0 : index
      %43 = vector.load %arg6[%c0_28, %c0_29] : memref<8x1xf32, #tpu.memory_space<vmem>>, vector<8x1xf32>
      %44 = math.log %43 : vector<8x1xf32>
      %45 = arith.addf %42, %44 : vector<8x1xf32>
      %c0_30 = arith.constant 0 : index
      %c0_31 = arith.constant 0 : index
      %46 = vector.load %arg8[%c0_30, %c0_31] : memref<8x1xf32, #tpu.memory_space<vmem>>, vector<8x1xf32>
      %cst_32 = arith.constant 0.899999976 : f32
      %47 = vector.broadcast %cst_32 : f32 to vector<8x1xf32>
      %48 = arith.mulf %47, %46 : vector<8x1xf32>
      %49 = arith.subf %45, %48 : vector<8x1xf32>
      %c0_33 = arith.constant 0 : index
      %c0_34 = arith.constant 0 : index
      %50 = vector.load %arg7[%c0_33, %c0_34] : memref<8x1xf32, #tpu.memory_space<vmem>>, vector<8x1xf32>
      %cst_35 = arith.constant 6.250000e-03 : f32
      %51 = vector.broadcast %cst_35 : f32 to vector<8x1xf32>
      %52 = arith.mulf %51, %50 : vector<8x1xf32>
      %53 = arith.subf %49, %52 : vector<8x1xf32>
      %c0_36 = arith.constant 0 : index
      %c0_37 = arith.constant 0 : index
      %54 = vector.load %arg4[%c0_36, %c0_37] : memref<8x1xf32, #tpu.memory_space<vmem>>, vector<8x1xf32>
      tpu.vector_store %arg4[%c0_36, %c0_37], %53 {strides = array<i32>} : memref<8x1xf32, #tpu.memory_space<vmem>>, vector<8x1xf32>,
    } else {
    }
    return
  }
  func.func @transform_0(%arg0: i32, %arg1: i32) -> (i32, i32) {
    %c0_i32 = arith.constant 0 : i32
    %c0_i32_0 = arith.constant 0 : i32
    return %arg0, %c0_i32 : i32, i32
  }
  func.func @transform_1(%arg0: i32, %arg1: i32) -> (i32, i32) {
    %c0_i32 = arith.constant 0 : i32
    return %arg0, %arg1 : i32, i32
  }
  func.func @transform_2(%arg0: i32, %arg1: i32) -> (i32, i32) {
    %c0_i32 = arith.constant 0 : i32
    %c0_i32_0 = arith.constant 0 : i32
    return %arg0, %c0_i32 : i32, i32
  }
}

</mosaic_0001>

<bundles_post_ra>
// kernel: tpu_custom_call.1
= control target key start
LH: loop header
LB: loop body
LE: loop exit
PB: predicated region body
PF: predicated region fallthrough
CT: control target
= control target key end

     0   :  { %vm27_vm0 = vcmask 130048   ;;  %vm15_vm1 = vcmask 7168   ;;  %v100_v1 = vmov -1e+30   ;;  %v101_v3 = vmov 0   ;;  %s140_s1 = inlined_call_operand.vmem [shape: f32[8,16], index: 1, kind: input, shape index: {}]   ;;  %s141_s0 = inlined_call_operand.vmem [shape: s32[8,1], index: 0, kind: input, shape index: {}]   ;;  %s142_s2 = inlined_call_operand.vmem [shape: f32[8,1], index: 2, kind: output, shape index: {}]  }
   0x1   :  { %v20_v0 = vld [vmem:[%s140_s1] sm:$0xff]  ;;  %16 = vst.msk [vmem:[#allocation2] sm:$0xff] %vm15_vm1, %v100_v1  ;;  %92 = vset.pattern.permute.xlu0 %v101_v3  ;;  %93 = vset.pattern.permute.xlu1 %v101_v3  ;;  %v102_v4 = vmov 0.0   ;;  %v21_v10 = vlaneseq }
   0x2   :  { %v28_v2 = vsel %vm27_vm0, %v20_v0, -inf  ;;  %17 = vst.msk [vmem:[#allocation3] sm:$0xff] %vm15_vm1, %v102_v4  ;;  %v59_v5 = vld [vmem:[%s141_s0] sm:$0xff]  ;;  %v53_v15 = vsel %vm27_vm0, %v20_v0, 0.0 }
   0x3   :  { %29 = vmax.xlane.f32.xlu0 %v28_v2  ;;  %18 = vst.msk [vmem:[#allocation4] sm:$0xff] %vm15_vm1, %v102_v4  ;;  %61 = vperm.xlu1 %93, %v59_v5   ;;  %v22_v11 = vand.u32 127, %v21_v10 }
   0x4   :  { %19 = vst.msk [vmem:[#allocation5] sm:$0xff] %vm15_vm1, %v102_v4 }
   0x8   :  { %v26_v6 = vld [vmem:[#allocation2] sm:$0xff] }
   0x9   :  { %v32_v29 = vld [vmem:[#allocation3] sm:$0xff] }
   0xa   :  { %v52_v24 = vld [vmem:[#allocation4] sm:$0xff] }
   0xb   :  { %v58_v21 = vld [vmem:[#allocation5] sm:$0xff] }
  0x75   :  { %v62_v12 = vpop.permute.xlu1 %61 }
  0x76   :  { %v30_v7 = vpop.xlane.xlu0 %29  ;;  %vm63_vm2 = vcmp.eq.s32.totalorder %v22_v11, %v62_v12 }
  0x77   :  { %v31_v8 = vmax.f32 %v26_v6, %v30_v7  ;;  %v64_v13 = vsel %vm63_vm2, %v20_v0, 0.0 }
  0x78   :  { %v65_v14 = vsel %vm27_vm0, %v64_v13, 0.0 }
  0x79   :  { %v33_v9 = vsub.f32 %v26_v6, %v31_v8  ;;  %51 = vst.msk [vmem:[#allocation2] sm:$0xff] %vm15_vm1, %v31_v8  ;;  %39 = vperm.xlu0 %92, %v31_v8   ;;  %66 = vadd.xlane.f32.xlu2 %v65_v14 }
  0x7b   :  { %v34_v27 = vmul.f32 1.442695, %v33_v9 }
  0x80   :  { %v73_v38 = vld [vmem:[#allocation2] sm:$0xff] }
  0x81   :  { %54 = vadd.xlane.f32.xlu2 %v53_v15 }
  0xeb   :  { %v40_v16 = vpop.permute.xlu0 %39 }
  0xec   :  { %v42_v17 = vsub.f32 %v20_v0, %v40_v16  ;;  %v67_v22 = vpop.xlane.xlu2 %66 }
  0xed   :  { %v68_v23 = vadd.f32 %v67_v22, %v58_v21 }
  0xee   :  { %v43_v18 = vmul.f32 1.442695, %v42_v17 }
  0xef   :  { %69 = vst.msk [vmem:[#allocation5] sm:$0xff] %vm15_vm1, %v68_v23 }
  0xf0   :  { %94 = vpow2.f32 %v43_v18 }
  0xf1   :  { %96 = vpow2.f32 %v34_v27 }
  0xf4   :  { %v55_v25 = vpop.xlane.xlu2 %54 }
  0xf5   :  { %v56_v26 = vadd.f32 %v55_v25, %v52_v24 }
  0xf6   :  { %v95_v19 = vpop.eup %94  ;;  %v78_v35 = vld [vmem:[#allocation5] sm:$0xff] }
  0xf7   :  { %v45_v20 = vsel %vm27_vm0, %v95_v19, 0.0  ;;  %57 = vst.msk [vmem:[#allocation4] sm:$0xff] %vm15_vm1, %v56_v26  ;;  %v97_v28 = vpop.eup %96  ;;  %v79_v40 = vmul.f32 0.9, %v78_v35 }
  0xf8   :  { %46 = vadd.xlane.f32.xlu1 %v45_v20  ;;  %v36_v30 = vmul.f32 %v97_v28, %v32_v29 }
  0xfe   :  { %v81_v36 = vld [vmem:[#allocation4] sm:$0xff] }
  0xff   :  { %v82_v41 = vmul.f32 0.00625, %v81_v36 }
 0x16b   :  { %v47_v31 = vpop.xlane.xlu1 %46 }
 0x16c   :  { %v48_v32 = vadd.f32 %v47_v31, %v36_v30 }
 0x16e   :  { %50 = vst.msk [vmem:[#allocation3] sm:$0xff] %vm15_vm1, %v48_v32 }
 0x175   :  { %v74_v33 = vld [vmem:[#allocation3] sm:$0xff] }
 0x176   :  { %98 = vlog2.f32 %v74_v33 }
 0x17c   :  { %v99_v34 = vpop.eup %98 }
 0x17d   :  { %v76_v37 = vmul.f32 0.6931472, %v99_v34 }
 0x17f   :  { %v77_v39 = vadd.f32 %v76_v37, %v73_v38 }
 0x181   :  { %v80_v42 = vsub.f32 %v77_v39, %v79_v40 }
 0x183   :  { %v83_v43 = vsub.f32 %v80_v42, %v82_v41 }
 0x185   :  { %84 = vst.msk [vmem:[%s142_s2] sm:$0xff] %vm15_vm1, %v83_v43 }

</bundles_post_ra>
